<compile_context>
chip_gen: v7x
topology: tpu7x:2x2x1
jax: 0.10.0
libtpu: 0.0.40
codegen_flags: <defaults>
</compile_context>

<pallas_src>
import math

import jax
import jax.numpy as jnp
from jax.experimental import pallas as pl
from jax.experimental.pallas import tpu as pltpu

SPECTRUM_DIM = 16
VAE_HIDDENS = [10, 8, 6, 4]   # hiddens[0] == 10 is required by the module
PARAM_LANES = 128             # param slab lane width (biases replicated)


def _pad_to(n, m):
    return ((n + m - 1) // m) * m


# ----------------------------------------------------------------------------
# Deterministic parameter init (mirrors reset_parameters: U(-1/sqrt(fan_in), .))
# Weights are stored as (in_features, out_features) so the reference does x @ w.
# ----------------------------------------------------------------------------
def _init_linear(key, in_f, out_f):
    kw, kb = jax.random.split(key)
    stv = 1.0 / math.sqrt(in_f)
    w = jax.random.uniform(kw, (in_f, out_f), jnp.float32, -stv, stv)
    b = jax.random.uniform(kb, (1, out_f), jnp.float32, -stv, stv)
    return w, b


def init_params(key, spectrum_dim=SPECTRUM_DIM, hiddens=VAE_HIDDENS):
    assert hiddens[0] == 10, "fc_enc_mmse_stage requires vae_hiddens[0] == 10"
    n_mid = len(hiddens) - 2
    keys = iter(jax.random.split(key, 7 + 2 * n_mid))
    params = {}
    params["enc_stage"] = _init_linear(next(keys), spectrum_dim, 8)
    params["enc_mmse_stage"] = _init_linear(next(keys), 10, 10)
    params["enc"] = [_init_linear(next(keys), hiddens[i], hiddens[i + 1])
                     for i in range(n_mid)]
    params["enc_mu"] = _init_linear(next(keys), hiddens[-2], hiddens[-1])
    params["enc_logvar"] = _init_linear(next(keys), hiddens[-2], hiddens[-1])
    dec_src = list(range(len(hiddens)))[::-1][:-2]
    params["dec"] = [_init_linear(next(keys), hiddens[i], hiddens[i - 1])
                     for i in dec_src]
    params["dec_stage"] = _init_linear(next(keys), hiddens[1], spectrum_dim)
    params["dec_mmse"] = _init_linear(next(keys), hiddens[1], 1)
    params["dec_age"] = _init_linear(next(keys), hiddens[1], 1)
    return params


# ----------------------------------------------------------------------------
# Feature-major packing: one parameter slab, one input slab, one output slab.
# ----------------------------------------------------------------------------
def build_layout(spectrum_dim, hiddens):
    """Sublane-row layout of the packed parameter slab (W^T + bias columns)."""
    n_mid = len(hiddens) - 2
    L = hiddens[-1]
    wdims = [("enc_stage", spectrum_dim, 8), ("enc_ms", 10, 10)]
    for i in range(n_mid):
        wdims.append((f"enc{i}", hiddens[i], hiddens[i + 1]))
    wdims.append(("mulv", hiddens[-2], 2 * L))                 # mu | logvar fused
    dec_src = list(range(len(hiddens)))[::-1][:-2]
    for j, i in enumerate(dec_src):
        wdims.append((f"dec{j}", hiddens[i], hiddens[i - 1]))
    wdims.append(("heads", hiddens[1], spectrum_dim + 2))      # stage|mmse|age fused
    row = 0
    w_off, b_off = {}, {}
    for name, _, fo in wdims:
        w_off[name] = row
        row += _pad_to(fo, 8)        # W^T is (fo, fi): fo rows, sublane-aligned
    for name, _, fo in wdims:
        b_off[name] = row
        row += _pad_to(fo, 8)        # bias column: fo rows, sublane-aligned
    total = _pad_to(row, 8)
    return wdims, w_off, b_off, total


def _io_rows(spectrum_dim, L):
    in_rows = _pad_to(spectrum_dim + 2 + L, 8)       # x_stage|x_mmse|x_age|eps
    out_rows = _pad_to(3 * L + spectrum_dim + 2, 8)  # z|mu|logvar|stage|mmse|age
    return in_rows, out_rows


def pack_params(params, layout, lanes=PARAM_LANES):
    wdims, w_off, b_off, total = layout
    fused = {
        "enc_stage": params["enc_stage"],
        "enc_ms": params["enc_mmse_stage"],
        "mulv": (
            jnp.concatenate([params["enc_mu"][0], params["enc_logvar"][0]], axis=1),
            jnp.concatenate([params["enc_mu"][1], params["enc_logvar"][1]], axis=1),
        ),
        "heads": (
            jnp.concatenate([params["dec_stage"][0], params["dec_mmse"][0],
                             params["dec_age"][0]], axis=1),
            jnp.concatenate([params["dec_stage"][1], params["dec_mmse"][1],
                             params["dec_age"][1]], axis=1),
        ),
    }
    for i, wb in enumerate(params["enc"]):
        fused[f"enc{i}"] = wb
    for i, wb in enumerate(params["dec"]):
        fused[f"dec{i}"] = wb

    slab = jnp.zeros((total, lanes), jnp.float32)
    for name, fi, fo in wdims:
        w, b = fused[name]
        assert w.shape == (fi, fo), (name, w.shape, (fi, fo))
        wT = w.astype(jnp.float32).T                                   # (fo, fi)
        slab = slab.at[w_off[name]:w_off[name] + fo, 0:fi].set(wT)
        bcol = jnp.broadcast_to(b.astype(jnp.float32).reshape(fo, 1), (fo, lanes))
        slab = slab.at[b_off[name]:b_off[name] + fo, :].set(bcol)      # replicated
    return slab


# ----------------------------------------------------------------------------
# The Pallas kernel: full ADPENVAE forward on one batch-lane tile.
# ----------------------------------------------------------------------------
def _build_kernel(layout, spectrum_dim, hiddens):
    wdims, w_off, b_off, _ = layout
    dims = {name: (fi, fo) for name, fi, fo in wdims}
    n_mid = len(hiddens) - 2
    L = hiddens[-1]
    S = spectrum_dim

    def kernel(x_ref, p_ref, o_ref):
        tb = x_ref.shape[1]            # static: lanes per tile (batch)

        def weight(name):
            fi, fo = dims[name]
            ro = w_off[name]
            return p_ref[ro:ro + fo, 0:fi]                  # W^T, (fo, fi)

        def bias(name):
            fo = dims[name][1]
            bo = b_off[name]
            if tb == PARAM_LANES:
                return p_ref[bo:bo + fo, :]                 # pre-replicated, no bcast
            return p_ref[bo:bo + fo, 0:1]                   # column, lane-broadcast

        relu = lambda v: jnp.maximum(v, 0.0)
        dot = lambda a, b: jnp.dot(a, b, preferred_element_type=jnp.float32)

        # feature-major input slab: rows = features, lanes = batch
        x_stage = x_ref[0:S, :]                    # (16, TB)
        x_mmse = x_ref[S:S + 1, :]                 # (1, TB)
        x_age = x_ref[S + 1:S + 2, :]              # (1, TB)
        eps = x_ref[S + 2:S + 2 + L, :]            # (L, TB)

        # encoder stage branch: e_stage = ReLU(W^T @ x_stage + b)
        e_stage = relu(dot(weight("enc_stage"), x_stage) + bias("enc_stage"))

        # ReLU(W_ms @ cat([e_stage, x_mmse, x_age], feature-axis) + b), concat-free
        ro, fo = w_off["enc_ms"], dims["enc_ms"][1]
        w_s = p_ref[ro:ro + fo, 0:8]
        w_m = p_ref[ro:ro + fo, 8:9]
        w_a = p_ref[ro:ro + fo, 9:10]
        e = relu(dot(w_s, e_stage) + w_m * x_mmse + w_a * x_age + bias("enc_ms"))

        # encoder MLP
        for i in range(n_mid):
            e = relu(dot(weight(f"enc{i}"), e) + bias(f"enc{i}"))

        # fused mu | logvar head (one matmul), then reparameterize
        mulv = dot(weight("mulv"), e) + bias("mulv")        # (2L, TB)
        z_mu = mulv[0:L, :]
        z_lv = mulv[L:2 * L, :]
        z = 1e-6 + z_mu + eps * jnp.exp(0.5 * z_lv)

        # decoder MLP
        d = z
        for i in range(n_mid):
            d = relu(dot(weight(f"dec{i}"), d) + bias(f"dec{i}"))

        # fused decoder heads: [stage logits | mmse | age] in one matmul
        heads = dot(weight("heads"), d) + bias("heads")     # (S+2, TB)
        logits = heads[0:S, :]
        x_hat_mmse = heads[S:S + 1, :]
        x_hat_age = heads[S + 1:S + 2, :]

        # softmax over the feature (sublane) axis; EUP reciprocal for the denom
        m = jnp.max(logits, axis=0, keepdims=True)
        ex = jnp.exp(logits - m)
        inv = pl.reciprocal(jnp.sum(ex, axis=0, keepdims=True), approx=True)
        x_hat_stage = ex * inv

        # direct contiguous sublane-slice stores (full-lane, unmasked on lanes)
        o_ref[0:L, :] = z
        o_ref[L:2 * L, :] = z_mu
        o_ref[2 * L:3 * L, :] = z_lv
        s0 = 3 * L
        o_ref[s0:s0 + S, :] = x_hat_stage
        o_ref[s0 + S:s0 + S + 1, :] = x_hat_mmse
        o_ref[s0 + S + 1:s0 + S + 2, :] = x_hat_age
        used = s0 + S + 2
        out_rows = o_ref.shape[0]
        if out_rows > used:
            o_ref[used:out_rows, :] = jnp.zeros((out_rows - used, tb), jnp.float32)

    return kernel


def adpen_vae_forward(params, x_stage, x_mmse, x_age, eps,
                      hiddens=VAE_HIDDENS, spectrum_dim=SPECTRUM_DIM,
                      batch_tile=8192):
    B = x_stage.shape[0]
    L = hiddens[-1]
    S = spectrum_dim
    layout = build_layout(S, hiddens)
    p_rows = layout[3]
    in_rows, out_rows = _io_rows(S, L)

    # Batch lives on the LANE axis. Tiles are 128-lane multiples; large batches
    # get multi-MiB tiles (batch_tile lanes) to amortize per-step overhead and
    # give v7x's two TensorCores a multi-step "parallel" grid to split.
    if B <= batch_tile:
        TB = _pad_to(max(B, 1), 128)
        B_pad = TB
    else:
        TB = _pad_to(batch_tile, 128)
        B_pad = _pad_to(B, TB)
    grid = (B_pad // TB,)

    p_slab = pack_params(params, layout)                    # (~176, 128), VMEM-resident

    # Feature-major input slab; padded batch columns are zero, so no garbage
    # flows through exp() on the ragged last tile.
    x_slab = jnp.zeros((in_rows, B_pad), jnp.float32)
    x_slab = x_slab.at[0:S, 0:B].set(x_stage.T.astype(jnp.float32))
    x_slab = x_slab.at[S:S + 1, 0:B].set(x_mmse.T.astype(jnp.float32))
    x_slab = x_slab.at[S + 1:S + 2, 0:B].set(x_age.T.astype(jnp.float32))
    x_slab = x_slab.at[S + 2:S + 2 + L, 0:B].set(eps.T.astype(jnp.float32))

    kernel = _build_kernel(layout, S, hiddens)
    x_spec = pl.BlockSpec((in_rows, TB), lambda i: (0, i))
    o_spec = pl.BlockSpec((out_rows, TB), lambda i: (0, i))

    def call(param_spec):
        return pl.pallas_call(
            kernel,
            out_shape=jax.ShapeDtypeStruct((out_rows, B_pad), jnp.float32),
            grid_spec=pltpu.PrefetchScalarGridSpec(
                num_scalar_prefetch=0,
                grid=grid,
                in_specs=[x_spec, param_spec],
                out_specs=o_spec,
            ),
            compiler_params=pltpu.CompilerParams(
                dimension_semantics=("parallel",),          # megacore batch split
                vmem_limit_bytes=32 * 1024 * 1024,          # safe on v5e/v6e/v7x
            ),
        )(x_slab, p_slab)

    # Param block index never changes -> request a single buffer to free the
    # second VMEM copy; fall back to the default spec if this build rejects it.
    try:
        out_slab = call(pl.BlockSpec((p_rows, PARAM_LANES), lambda i: (0, 0),
                                     pipeline_mode=pl.Buffered(1)))
    except Exception:
        out_slab = call(pl.BlockSpec((p_rows, PARAM_LANES), lambda i: (0, 0)))

    # Unpack feature rows back to batch-major outputs (layout plumbing only).
    z = out_slab[0:L, 0:B].T
    z_mu = out_slab[L:2 * L, 0:B].T
    z_lv = out_slab[2 * L:3 * L, 0:B].T
    s0 = 3 * L
    x_hat_stage = out_slab[s0:s0 + S, 0:B].T
    x_hat_mmse = out_slab[s0 + S:s0 + S + 1, 0:B].T
    x_hat_age = out_slab[s0 + S + 1:s0 + S + 2, 0:B].T
    return z, z_mu, z_lv, x_hat_stage, x_hat_mmse, x_hat_age


# ----------------------------------------------------------------------------
# Pure-JAX reference for validation
# ----------------------------------------------------------------------------
def reference_forward(params, x_stage, x_mmse, x_age, eps):
    relu = lambda v: jnp.maximum(v, 0.0)
    w, b = params["enc_stage"]
    e_stage = relu(x_stage @ w + b)
    w, b = params["enc_mmse_stage"]
    e = relu(jnp.concatenate([e_stage, x_mmse, x_age], axis=1) @ w + b)
    for w, b in params["enc"]:
        e = relu(e @ w + b)
    w, b = params["enc_mu"]; z_mu = e @ w + b
    w, b = params["enc_logvar"]; z_lv = e @ w + b
    z = 1e-6 + z_mu + eps * jnp.exp(0.5 * z_lv)
    d = z
    for w, b in params["dec"]:
        d = relu(d @ w + b)
    w, b = params["dec_stage"]
    x_hat_stage = jax.nn.softmax(d @ w + b, axis=1)
    w, b = params["dec_mmse"]; x_hat_mmse = d @ w + b
    w, b = params["dec_age"]; x_hat_age = d @ w + b
    return z, z_mu, z_lv, x_hat_stage, x_hat_mmse, x_hat_age


if __name__ == "__main__":
    key = jax.random.PRNGKey(0)
    kp, kx1, kx2, kx3, keps = jax.random.split(key, 5)

    B = 8
    params = init_params(kp)
    x_stage = jax.random.normal(kx1, (B, SPECTRUM_DIM), jnp.float32)
    x_mmse = jax.random.normal(kx2, (B, 1), jnp.float32)
    x_age = jax.random.normal(kx3, (B, 1), jnp.float32)
    eps = jax.random.normal(keps, (B, VAE_HIDDENS[-1]), jnp.float32)

    outs = adpen_vae_forward(params, x_stage, x_mmse, x_age, eps)
    outs = jax.block_until_ready(outs)

    refs = reference_forward(params, x_stage, x_mmse, x_age, eps)
    names = ["z", "z_mu", "z_logvar", "x_hat_stage", "x_hat_mmse", "x_hat_age"]
    for name, o, r in zip(names, outs, refs):
        assert o.shape == r.shape, (name, o.shape, r.shape)
        assert bool(jnp.all(jnp.isfinite(o))), name
        assert bool(jnp.allclose(o, r, atol=2e-2, rtol=2e-2)), (
            name, float(jnp.max(jnp.abs(o - r))))

    print("KERNEL_OK")
</pallas_src>

<mosaic_0001>
module attributes {stable_mosaic.version = 11 : i64} {
  func.func @kernel(%arg0: i32, %arg1: memref<24x128xf32, #tpu.memory_space<vmem>>, %arg2: memref<176x128xf32, #tpu.memory_space<vmem>>, %arg3: memref<32x128xf32, #tpu.memory_space<vmem>>) attributes {dimension_semantics = [#tpu.dimension_semantics<parallel>], iteration_bounds = array<i64: 1>, scalar_prefetch = 0 : i64, scratch_operands = 0 : i64, tpu.core_type = #tpu.core_type<tc>, window_params = [{transform_indices = @transform_0, window_bounds = array<i64: 24, 128>}, {pipeline_mode = #tpu.pipeline_mode<synchronous>, transform_indices = @transform_1, window_bounds = array<i64: 176, 128>}, {transform_indices = @transform_2, window_bounds = array<i64: 32, 128>}]} {
    %c0 = arith.constant 0 : index
    %c0_0 = arith.constant 0 : index
    %0 = vector.load %arg1[%c0, %c0_0] : memref<24x128xf32, #tpu.memory_space<vmem>>, vector<16x128xf32>
    %c16 = arith.constant 16 : index
    %c0_1 = arith.constant 0 : index
    %1 = vector.load %arg1[%c16, %c0_1] : memref<24x128xf32, #tpu.memory_space<vmem>>, vector<1x128xf32>
    %c17 = arith.constant 17 : index
    %c0_2 = arith.constant 0 : index
    %2 = vector.load %arg1[%c17, %c0_2] : memref<24x128xf32, #tpu.memory_space<vmem>>, vector<1x128xf32>
    %c18 = arith.constant 18 : index
    %c0_3 = arith.constant 0 : index
    %3 = vector.load %arg1[%c18, %c0_3] : memref<24x128xf32, #tpu.memory_space<vmem>>, vector<4x128xf32>
    %c0_4 = arith.constant 0 : index
    %c0_5 = arith.constant 0 : index
    %4 = vector.load %arg2[%c0_4, %c0_5] : memref<176x128xf32, #tpu.memory_space<vmem>>, vector<8x16xf32>
    %cst = arith.constant dense<0.000000e+00> : vector<8x128xf32>
    %5 = tpu.matmul %4, %0, %cst {dimension_numbers = #tpu.dot_dimension_numbers<[1], [0], [0], [1], [0, 0, 1, 1], [], []>} : vector<8x16xf32>, vector<16x128xf32>, vector<8x128xf32> -> vector<8x128xf32>
    %c88 = arith.constant 88 : index
    %c0_6 = arith.constant 0 : index
    %6 = vector.load %arg2[%c88, %c0_6] : memref<176x128xf32, #tpu.memory_space<vmem>>, vector<8x128xf32>
    %7 = arith.addf %5, %6 : vector<8x128xf32>
    %cst_7 = arith.constant 0.000000e+00 : f32
    %8 = vector.broadcast %cst_7 : f32 to vector<8x128xf32>
    %9 = arith.maximumf %7, %8 : vector<8x128xf32>
    %c8 = arith.constant 8 : index
    %c0_8 = arith.constant 0 : index
    %10 = vector.load %arg2[%c8, %c0_8] : memref<176x128xf32, #tpu.memory_space<vmem>>, vector<10x8xf32>
    %c8_9 = arith.constant 8 : index
    %c8_10 = arith.constant 8 : index
    %11 = vector.load %arg2[%c8_9, %c8_10] : memref<176x128xf32, #tpu.memory_space<vmem>>, vector<10x1xf32>
    %c8_11 = arith.constant 8 : index
    %c9 = arith.constant 9 : index
    %12 = vector.load %arg2[%c8_11, %c9] : memref<176x128xf32, #tpu.memory_space<vmem>>, vector<10x1xf32>
    %cst_12 = arith.constant dense<0.000000e+00> : vector<10x128xf32>
    %13 = tpu.matmul %10, %9, %cst_12 {dimension_numbers = #tpu.dot_dimension_numbers<[1], [0], [0], [1], [0, 0, 1, 1], [], []>} : vector<10x8xf32>, vector<8x128xf32>, vector<10x128xf32> -> vector<10x128xf32>
    %14 = vector.broadcast %11 : vector<10x1xf32> to vector<10x128xf32>
    %15 = vector.broadcast %1 : vector<1x128xf32> to vector<10x128xf32>
    %16 = arith.mulf %14, %15 : vector<10x128xf32>
    %17 = arith.addf %13, %16 : vector<10x128xf32>
    %18 = vector.broadcast %12 : vector<10x1xf32> to vector<10x128xf32>
    %19 = vector.broadcast %2 : vector<1x128xf32> to vector<10x128xf32>
    %20 = arith.mulf %18, %19 : vector<10x128xf32>
    %21 = arith.addf %17, %20 : vector<10x128xf32>
    %c96 = arith.constant 96 : index
    %c0_13 = arith.constant 0 : index
    %22 = vector.load %arg2[%c96, %c0_13] : memref<176x128xf32, #tpu.memory_space<vmem>>, vector<10x128xf32>
    %23 = arith.addf %21, %22 : vector<10x128xf32>
    %cst_14 = arith.constant 0.000000e+00 : f32
    %24 = vector.broadcast %cst_14 : f32 to vector<10x128xf32>
    %25 = arith.maximumf %23, %24 : vector<10x128xf32>
    %c24 = arith.constant 24 : index
    %c0_15 = arith.constant 0 : index
    %26 = vector.load %arg2[%c24, %c0_15] : memref<176x128xf32, #tpu.memory_space<vmem>>, vector<8x10xf32>
    %cst_16 = arith.constant dense<0.000000e+00> : vector<8x128xf32>
    %27 = tpu.matmul %26, %25, %cst_16 {dimension_numbers = #tpu.dot_dimension_numbers<[1], [0], [0], [1], [0, 0, 1, 1], [], []>} : vector<8x10xf32>, vector<10x128xf32>, vector<8x128xf32> -> vector<8x128xf32>
    %c112 = arith.constant 112 : index
    %c0_17 = arith.constant 0 : index
    %28 = vector.load %arg2[%c112, %c0_17] : memref<176x128xf32, #tpu.memory_space<vmem>>, vector<8x128xf32>
    %29 = arith.addf %27, %28 : vector<8x128xf32>
    %cst_18 = arith.constant 0.000000e+00 : f32
    %30 = vector.broadcast %cst_18 : f32 to vector<8x128xf32>
    %31 = arith.maximumf %29, %30 : vector<8x128xf32>
    %c32 = arith.constant 32 : index
    %c0_19 = arith.constant 0 : index
    %32 = vector.load %arg2[%c32, %c0_19] : memref<176x128xf32, #tpu.memory_space<vmem>>, vector<6x8xf32>
    %cst_20 = arith.constant dense<0.000000e+00> : vector<6x128xf32>
    %33 = tpu.matmul %32, %31, %cst_20 {dimension_numbers = #tpu.dot_dimension_numbers<[1], [0], [0], [1], [0, 0, 1, 1], [], []>} : vector<6x8xf32>, vector<8x128xf32>, vector<6x128xf32> -> vector<6x128xf32>
    %c120 = arith.constant 120 : index
    %c0_21 = arith.constant 0 : index
    %34 = vector.load %arg2[%c120, %c0_21] : memref<176x128xf32, #tpu.memory_space<vmem>>, vector<6x128xf32>
    %35 = arith.addf %33, %34 : vector<6x128xf32>
    %cst_22 = arith.constant 0.000000e+00 : f32
    %36 = vector.broadcast %cst_22 : f32 to vector<6x128xf32>
    %37 = arith.maximumf %35, %36 : vector<6x128xf32>
    %c40 = arith.constant 40 : index
    %c0_23 = arith.constant 0 : index
    %38 = vector.load %arg2[%c40, %c0_23] : memref<176x128xf32, #tpu.memory_space<vmem>>, vector<8x6xf32>
    %cst_24 = arith.constant dense<0.000000e+00> : vector<8x128xf32>
    %39 = tpu.matmul %38, %37, %cst_24 {dimension_numbers = #tpu.dot_dimension_numbers<[1], [0], [0], [1], [0, 0, 1, 1], [], []>} : vector<8x6xf32>, vector<6x128xf32>, vector<8x128xf32> -> vector<8x128xf32>
    %c128 = arith.constant 128 : index
    %c0_25 = arith.constant 0 : index
    %40 = vector.load %arg2[%c128, %c0_25] : memref<176x128xf32, #tpu.memory_space<vmem>>, vector<8x128xf32>
    %41 = arith.addf %39, %40 : vector<8x128xf32>
    %42 = vector.extract_strided_slice %41 {offsets = [0, 0], sizes = [4, 128], strides = [1, 1]} : vector<8x128xf32> to vector<4x128xf32>
    %43 = vector.extract_strided_slice %41 {offsets = [4, 0], sizes = [4, 128], strides = [1, 1]} : vector<8x128xf32> to vector<4x128xf32>
    %cst_26 = arith.constant 9.99999997E-7 : f32
    %44 = vector.broadcast %cst_26 : f32 to vector<4x128xf32>
    %45 = arith.addf %44, %42 : vector<4x128xf32>
    %cst_27 = arith.constant 5.000000e-01 : f32
    %46 = vector.broadcast %cst_27 : f32 to vector<4x128xf32>
    %47 = arith.mulf %46, %43 : vector<4x128xf32>
    %48 = math.exp %47 : vector<4x128xf32>
    %49 = arith.mulf %3, %48 : vector<4x128xf32>
    %50 = arith.addf %45, %49 : vector<4x128xf32>
    %c48 = arith.constant 48 : index
    %c0_28 = arith.constant 0 : index
    %51 = vector.load %arg2[%c48, %c0_28] : memref<176x128xf32, #tpu.memory_space<vmem>>, vector<6x4xf32>
    %cst_29 = arith.constant dense<0.000000e+00> : vector<6x128xf32>
    %52 = tpu.matmul %51, %50, %cst_29 {dimension_numbers = #tpu.dot_dimension_numbers<[1], [0], [0], [1], [0, 0, 1, 1], [], []>} : vector<6x4xf32>, vector<4x128xf32>, vector<6x128xf32> -> vector<6x128xf32>
    %c136 = arith.constant 136 : index
    %c0_30 = arith.constant 0 : index
    %53 = vector.load %arg2[%c136, %c0_30] : memref<176x128xf32, #tpu.memory_space<vmem>>, vector<6x128xf32>
    %54 = arith.addf %52, %53 : vector<6x128xf32>
    %cst_31 = arith.constant 0.000000e+00 : f32
    %55 = vector.broadcast %cst_31 : f32 to vector<6x128xf32>
    %56 = arith.maximumf %54, %55 : vector<6x128xf32>
    %c56 = arith.constant 56 : index
    %c0_32 = arith.constant 0 : index
    %57 = vector.load %arg2[%c56, %c0_32] : memref<176x128xf32, #tpu.memory_space<vmem>>, vector<8x6xf32>
    %cst_33 = arith.constant dense<0.000000e+00> : vector<8x128xf32>
    %58 = tpu.matmul %57, %56, %cst_33 {dimension_numbers = #tpu.dot_dimension_numbers<[1], [0], [0], [1], [0, 0, 1, 1], [], []>} : vector<8x6xf32>, vector<6x128xf32>, vector<8x128xf32> -> vector<8x128xf32>
    %c144 = arith.constant 144 : index
    %c0_34 = arith.constant 0 : index
    %59 = vector.load %arg2[%c144, %c0_34] : memref<176x128xf32, #tpu.memory_space<vmem>>, vector<8x128xf32>
    %60 = arith.addf %58, %59 : vector<8x128xf32>
    %cst_35 = arith.constant 0.000000e+00 : f32
    %61 = vector.broadcast %cst_35 : f32 to vector<8x128xf32>
    %62 = arith.maximumf %60, %61 : vector<8x128xf32>
    %c64 = arith.constant 64 : index
    %c0_36 = arith.constant 0 : index
    %63 = vector.load %arg2[%c64, %c0_36] : memref<176x128xf32, #tpu.memory_space<vmem>>, vector<18x8xf32>
    %cst_37 = arith.constant dense<0.000000e+00> : vector<18x128xf32>
    %64 = tpu.matmul %63, %62, %cst_37 {dimension_numbers = #tpu.dot_dimension_numbers<[1], [0], [0], [1], [0, 0, 1, 1], [], []>} : vector<18x8xf32>, vector<8x128xf32>, vector<18x128xf32> -> vector<18x128xf32>
    %c152 = arith.constant 152 : index
    %c0_38 = arith.constant 0 : index
    %65 = vector.load %arg2[%c152, %c0_38] : memref<176x128xf32, #tpu.memory_space<vmem>>, vector<18x128xf32>
    %66 = arith.addf %64, %65 : vector<18x128xf32>
    %67 = vector.extract_strided_slice %66 {offsets = [0, 0], sizes = [16, 128], strides = [1, 1]} : vector<18x128xf32> to vector<16x128xf32>
    %68 = vector.extract_strided_slice %66 {offsets = [16, 0], sizes = [1, 128], strides = [1, 1]} : vector<18x128xf32> to vector<1x128xf32>
    %69 = vector.extract_strided_slice %66 {offsets = [17, 0], sizes = [1, 128], strides = [1, 1]} : vector<18x128xf32> to vector<1x128xf32>
    %cst_39 = arith.constant dense<0xFF800000> : vector<128xf32>
    %70 = vector.multi_reduction <maximumf>, %67, %cst_39 [0] : vector<16x128xf32> to vector<128xf32>
    %71 = vector.shape_cast %70 : vector<128xf32> to vector<1x128xf32>
    %72 = vector.broadcast %71 : vector<1x128xf32> to vector<16x128xf32>
    %73 = arith.subf %67, %72 : vector<16x128xf32>
    %74 = math.exp %73 : vector<16x128xf32>
    %cst_40 = arith.constant dense<0.000000e+00> : vector<128xf32>
    %75 = vector.multi_reduction <add>, %74, %cst_40 [0] : vector<16x128xf32> to vector<128xf32>
    %76 = vector.shape_cast %75 : vector<128xf32> to vector<1x128xf32>
    %77 = tpu.reciprocal %76 {approx = true} : vector<1x128xf32> -> vector<1x128xf32>
    %78 = vector.broadcast %77 : vector<1x128xf32> to vector<16x128xf32>
    %79 = arith.mulf %74, %78 : vector<16x128xf32>
    %c0_41 = arith.constant 0 : index
    %c0_42 = arith.constant 0 : index
    %80 = vector.load %arg3[%c0_41, %c0_42] : memref<32x128xf32, #tpu.memory_space<vmem>>, vector<4x128xf32>
    tpu.vector_store %arg3[%c0_41, %c0_42], %50 {strides = array<i32>} : memref<32x128xf32, #tpu.memory_space<vmem>>, vector<4x128xf32>,
    %c4 = arith.constant 4 : index
    %c0_43 = arith.constant 0 : index
    %81 = vector.load %arg3[%c4, %c0_43] : memref<32x128xf32, #tpu.memory_space<vmem>>, vector<4x128xf32>
    tpu.vector_store %arg3[%c4, %c0_43], %42 {strides = array<i32>} : memref<32x128xf32, #tpu.memory_space<vmem>>, vector<4x128xf32>,
    %c8_44 = arith.constant 8 : index
    %c0_45 = arith.constant 0 : index
    %82 = vector.load %arg3[%c8_44, %c0_45] : memref<32x128xf32, #tpu.memory_space<vmem>>, vector<4x128xf32>
    tpu.vector_store %arg3[%c8_44, %c0_45], %43 {strides = array<i32>} : memref<32x128xf32, #tpu.memory_space<vmem>>, vector<4x128xf32>,
    %c12 = arith.constant 12 : index
    %c0_46 = arith.constant 0 : index
    %83 = vector.load %arg3[%c12, %c0_46] : memref<32x128xf32, #tpu.memory_space<vmem>>, vector<16x128xf32>
    tpu.vector_store %arg3[%c12, %c0_46], %79 {strides = array<i32>} : memref<32x128xf32, #tpu.memory_space<vmem>>, vector<16x128xf32>,
    %c28 = arith.constant 28 : index
    %c0_47 = arith.constant 0 : index
    %84 = vector.load %arg3[%c28, %c0_47] : memref<32x128xf32, #tpu.memory_space<vmem>>, vector<1x128xf32>
    tpu.vector_store %arg3[%c28, %c0_47], %68 {strides = array<i32>} : memref<32x128xf32, #tpu.memory_space<vmem>>, vector<1x128xf32>,
    %c29 = arith.constant 29 : index
    %c0_48 = arith.constant 0 : index
    %85 = vector.load %arg3[%c29, %c0_48] : memref<32x128xf32, #tpu.memory_space<vmem>>, vector<1x128xf32>
    tpu.vector_store %arg3[%c29, %c0_48], %69 {strides = array<i32>} : memref<32x128xf32, #tpu.memory_space<vmem>>, vector<1x128xf32>,
    %cst_49 = arith.constant 0.000000e+00 : f32
    %86 = vector.broadcast %cst_49 : f32 to vector<2x128xf32>
    %c30 = arith.constant 30 : index
    %c0_50 = arith.constant 0 : index
    %87 = vector.load %arg3[%c30, %c0_50] : memref<32x128xf32, #tpu.memory_space<vmem>>, vector<2x128xf32>
    tpu.vector_store %arg3[%c30, %c0_50], %86 {strides = array<i32>} : memref<32x128xf32, #tpu.memory_space<vmem>>, vector<2x128xf32>,
    return
  }
  func.func @transform_0(%arg0: i32) -> (i32, i32) {
    %c0_i32 = arith.constant 0 : i32
    %c0_i32_0 = arith.constant 0 : i32
    return %c0_i32, %arg0 : i32, i32
  }
  func.func @transform_1(%arg0: i32) -> (i32, i32) {
    %c0_i32 = arith.constant 0 : i32
    %c0_i32_0 = arith.constant 0 : i32
    %c0_i32_1 = arith.constant 0 : i32
    return %c0_i32, %c0_i32_0 : i32, i32
  }
  func.func @transform_2(%arg0: i32) -> (i32, i32) {
    %c0_i32 = arith.constant 0 : i32
    %c0_i32_0 = arith.constant 0 : i32
    return %c0_i32, %arg0 : i32, i32
  }
}

module attributes {stable_mosaic.version = 11 : i64} {
  func.func @kernel(%arg0: i32, %arg1: memref<24x128xf32, #tpu.memory_space<vmem>>, %arg2: memref<176x128xf32, #tpu.memory_space<vmem>>, %arg3: memref<32x128xf32, #tpu.memory_space<vmem>>) attributes {dimension_semantics = [#tpu.dimension_semantics<parallel>], iteration_bounds = array<i64: 1>, scalar_prefetch = 0 : i64, scratch_operands = 0 : i64, tpu.core_type = #tpu.core_type<tc>, window_params = [{transform_indices = @transform_0, window_bounds = array<i64: 24, 128>}, {pipeline_mode = #tpu.pipeline_mode<synchronous>, transform_indices = @transform_1, window_bounds = array<i64: 176, 128>}, {transform_indices = @transform_2, window_bounds = array<i64: 32, 128>}]} {
    %c0 = arith.constant 0 : index
    %c0_0 = arith.constant 0 : index
    %0 = vector.load %arg1[%c0, %c0_0] : memref<24x128xf32, #tpu.memory_space<vmem>>, vector<16x128xf32>
    %c16 = arith.constant 16 : index
    %c0_1 = arith.constant 0 : index
    %1 = vector.load %arg1[%c16, %c0_1] : memref<24x128xf32, #tpu.memory_space<vmem>>, vector<1x128xf32>
    %c17 = arith.constant 17 : index
    %c0_2 = arith.constant 0 : index
    %2 = vector.load %arg1[%c17, %c0_2] : memref<24x128xf32, #tpu.memory_space<vmem>>, vector<1x128xf32>
    %c18 = arith.constant 18 : index
    %c0_3 = arith.constant 0 : index
    %3 = vector.load %arg1[%c18, %c0_3] : memref<24x128xf32, #tpu.memory_space<vmem>>, vector<4x128xf32>
    %c0_4 = arith.constant 0 : index
    %c0_5 = arith.constant 0 : index
    %4 = vector.load %arg2[%c0_4, %c0_5] : memref<176x128xf32, #tpu.memory_space<vmem>>, vector<8x16xf32>
    %cst = arith.constant dense<0.000000e+00> : vector<8x128xf32>
    %5 = tpu.matmul %4, %0, %cst {dimension_numbers = #tpu.dot_dimension_numbers<[1], [0], [0], [1], [0, 0, 1, 1], [], []>} : vector<8x16xf32>, vector<16x128xf32>, vector<8x128xf32> -> vector<8x128xf32>
    %c88 = arith.constant 88 : index
    %c0_6 = arith.constant 0 : index
    %6 = vector.load %arg2[%c88, %c0_6] : memref<176x128xf32, #tpu.memory_space<vmem>>, vector<8x128xf32>
    %7 = arith.addf %5, %6 : vector<8x128xf32>
    %cst_7 = arith.constant 0.000000e+00 : f32
    %8 = vector.broadcast %cst_7 : f32 to vector<8x128xf32>
    %9 = arith.maximumf %7, %8 : vector<8x128xf32>
    %c8 = arith.constant 8 : index
    %c0_8 = arith.constant 0 : index
    %10 = vector.load %arg2[%c8, %c0_8] : memref<176x128xf32, #tpu.memory_space<vmem>>, vector<10x8xf32>
    %c8_9 = arith.constant 8 : index
    %c8_10 = arith.constant 8 : index
    %11 = vector.load %arg2[%c8_9, %c8_10] : memref<176x128xf32, #tpu.memory_space<vmem>>, vector<10x1xf32>
    %c8_11 = arith.constant 8 : index
    %c9 = arith.constant 9 : index
    %12 = vector.load %arg2[%c8_11, %c9] : memref<176x128xf32, #tpu.memory_space<vmem>>, vector<10x1xf32>
    %cst_12 = arith.constant dense<0.000000e+00> : vector<10x128xf32>
    %13 = tpu.matmul %10, %9, %cst_12 {dimension_numbers = #tpu.dot_dimension_numbers<[1], [0], [0], [1], [0, 0, 1, 1], [], []>} : vector<10x8xf32>, vector<8x128xf32>, vector<10x128xf32> -> vector<10x128xf32>
    %14 = vector.broadcast %11 : vector<10x1xf32> to vector<10x128xf32>
    %15 = vector.broadcast %1 : vector<1x128xf32> to vector<10x128xf32>
    %16 = arith.mulf %14, %15 : vector<10x128xf32>
    %17 = arith.addf %13, %16 : vector<10x128xf32>
    %18 = vector.broadcast %12 : vector<10x1xf32> to vector<10x128xf32>
    %19 = vector.broadcast %2 : vector<1x128xf32> to vector<10x128xf32>
    %20 = arith.mulf %18, %19 : vector<10x128xf32>
    %21 = arith.addf %17, %20 : vector<10x128xf32>
    %c96 = arith.constant 96 : index
    %c0_13 = arith.constant 0 : index
    %22 = vector.load %arg2[%c96, %c0_13] : memref<176x128xf32, #tpu.memory_space<vmem>>, vector<10x128xf32>
    %23 = arith.addf %21, %22 : vector<10x128xf32>
    %cst_14 = arith.constant 0.000000e+00 : f32
    %24 = vector.broadcast %cst_14 : f32 to vector<10x128xf32>
    %25 = arith.maximumf %23, %24 : vector<10x128xf32>
    %c24 = arith.constant 24 : index
    %c0_15 = arith.constant 0 : index
    %26 = vector.load %arg2[%c24, %c0_15] : memref<176x128xf32, #tpu.memory_space<vmem>>, vector<8x10xf32>
    %cst_16 = arith.constant dense<0.000000e+00> : vector<8x128xf32>
    %27 = tpu.matmul %26, %25, %cst_16 {dimension_numbers = #tpu.dot_dimension_numbers<[1], [0], [0], [1], [0, 0, 1, 1], [], []>} : vector<8x10xf32>, vector<10x128xf32>, vector<8x128xf32> -> vector<8x128xf32>
    %c112 = arith.constant 112 : index
    %c0_17 = arith.constant 0 : index
    %28 = vector.load %arg2[%c112, %c0_17] : memref<176x128xf32, #tpu.memory_space<vmem>>, vector<8x128xf32>
    %29 = arith.addf %27, %28 : vector<8x128xf32>
    %cst_18 = arith.constant 0.000000e+00 : f32
    %30 = vector.broadcast %cst_18 : f32 to vector<8x128xf32>
    %31 = arith.maximumf %29, %30 : vector<8x128xf32>
    %c32 = arith.constant 32 : index
    %c0_19 = arith.constant 0 : index
    %32 = vector.load %arg2[%c32, %c0_19] : memref<176x128xf32, #tpu.memory_space<vmem>>, vector<6x8xf32>
    %cst_20 = arith.constant dense<0.000000e+00> : vector<6x128xf32>
    %33 = tpu.matmul %32, %31, %cst_20 {dimension_numbers = #tpu.dot_dimension_numbers<[1], [0], [0], [1], [0, 0, 1, 1], [], []>} : vector<6x8xf32>, vector<8x128xf32>, vector<6x128xf32> -> vector<6x128xf32>
    %c120 = arith.constant 120 : index
    %c0_21 = arith.constant 0 : index
    %34 = vector.load %arg2[%c120, %c0_21] : memref<176x128xf32, #tpu.memory_space<vmem>>, vector<6x128xf32>
    %35 = arith.addf %33, %34 : vector<6x128xf32>
    %cst_22 = arith.constant 0.000000e+00 : f32
    %36 = vector.broadcast %cst_22 : f32 to vector<6x128xf32>
    %37 = arith.maximumf %35, %36 : vector<6x128xf32>
    %c40 = arith.constant 40 : index
    %c0_23 = arith.constant 0 : index
    %38 = vector.load %arg2[%c40, %c0_23] : memref<176x128xf32, #tpu.memory_space<vmem>>, vector<8x6xf32>
    %cst_24 = arith.constant dense<0.000000e+00> : vector<8x128xf32>
    %39 = tpu.matmul %38, %37, %cst_24 {dimension_numbers = #tpu.dot_dimension_numbers<[1], [0], [0], [1], [0, 0, 1, 1], [], []>} : vector<8x6xf32>, vector<6x128xf32>, vector<8x128xf32> -> vector<8x128xf32>
    %c128 = arith.constant 128 : index
    %c0_25 = arith.constant 0 : index
    %40 = vector.load %arg2[%c128, %c0_25] : memref<176x128xf32, #tpu.memory_space<vmem>>, vector<8x128xf32>
    %41 = arith.addf %39, %40 : vector<8x128xf32>
    %42 = vector.extract_strided_slice %41 {offsets = [0, 0], sizes = [4, 128], strides = [1, 1]} : vector<8x128xf32> to vector<4x128xf32>
    %43 = vector.extract_strided_slice %41 {offsets = [4, 0], sizes = [4, 128], strides = [1, 1]} : vector<8x128xf32> to vector<4x128xf32>
    %cst_26 = arith.constant 9.99999997E-7 : f32
    %44 = vector.broadcast %cst_26 : f32 to vector<4x128xf32>
    %45 = arith.addf %44, %42 : vector<4x128xf32>
    %cst_27 = arith.constant 5.000000e-01 : f32
    %46 = vector.broadcast %cst_27 : f32 to vector<4x128xf32>
    %47 = arith.mulf %46, %43 : vector<4x128xf32>
    %48 = math.exp %47 : vector<4x128xf32>
    %49 = arith.mulf %3, %48 : vector<4x128xf32>
    %50 = arith.addf %45, %49 : vector<4x128xf32>
    %c48 = arith.constant 48 : index
    %c0_28 = arith.constant 0 : index
    %51 = vector.load %arg2[%c48, %c0_28] : memref<176x128xf32, #tpu.memory_space<vmem>>, vector<6x4xf32>
    %cst_29 = arith.constant dense<0.000000e+00> : vector<6x128xf32>
    %52 = tpu.matmul %51, %50, %cst_29 {dimension_numbers = #tpu.dot_dimension_numbers<[1], [0], [0], [1], [0, 0, 1, 1], [], []>} : vector<6x4xf32>, vector<4x128xf32>, vector<6x128xf32> -> vector<6x128xf32>
    %c136 = arith.constant 136 : index
    %c0_30 = arith.constant 0 : index
    %53 = vector.load %arg2[%c136, %c0_30] : memref<176x128xf32, #tpu.memory_space<vmem>>, vector<6x128xf32>
    %54 = arith.addf %52, %53 : vector<6x128xf32>
    %cst_31 = arith.constant 0.000000e+00 : f32
    %55 = vector.broadcast %cst_31 : f32 to vector<6x128xf32>
    %56 = arith.maximumf %54, %55 : vector<6x128xf32>
    %c56 = arith.constant 56 : index
    %c0_32 = arith.constant 0 : index
    %57 = vector.load %arg2[%c56, %c0_32] : memref<176x128xf32, #tpu.memory_space<vmem>>, vector<8x6xf32>
    %cst_33 = arith.constant dense<0.000000e+00> : vector<8x128xf32>
    %58 = tpu.matmul %57, %56, %cst_33 {dimension_numbers = #tpu.dot_dimension_numbers<[1], [0], [0], [1], [0, 0, 1, 1], [], []>} : vector<8x6xf32>, vector<6x128xf32>, vector<8x128xf32> -> vector<8x128xf32>
    %c144 = arith.constant 144 : index
    %c0_34 = arith.constant 0 : index
    %59 = vector.load %arg2[%c144, %c0_34] : memref<176x128xf32, #tpu.memory_space<vmem>>, vector<8x128xf32>
    %60 = arith.addf %58, %59 : vector<8x128xf32>
    %cst_35 = arith.constant 0.000000e+00 : f32
    %61 = vector.broadcast %cst_35 : f32 to vector<8x128xf32>
    %62 = arith.maximumf %60, %61 : vector<8x128xf32>
    %c64 = arith.constant 64 : index
    %c0_36 = arith.constant 0 : index
    %63 = vector.load %arg2[%c64, %c0_36] : memref<176x128xf32, #tpu.memory_space<vmem>>, vector<18x8xf32>
    %cst_37 = arith.constant dense<0.000000e+00> : vector<18x128xf32>
    %64 = tpu.matmul %63, %62, %cst_37 {dimension_numbers = #tpu.dot_dimension_numbers<[1], [0], [0], [1], [0, 0, 1, 1], [], []>} : vector<18x8xf32>, vector<8x128xf32>, vector<18x128xf32> -> vector<18x128xf32>
    %c152 = arith.constant 152 : index
    %c0_38 = arith.constant 0 : index
    %65 = vector.load %arg2[%c152, %c0_38] : memref<176x128xf32, #tpu.memory_space<vmem>>, vector<18x128xf32>
    %66 = arith.addf %64, %65 : vector<18x128xf32>
    %67 = vector.extract_strided_slice %66 {offsets = [0, 0], sizes = [16, 128], strides = [1, 1]} : vector<18x128xf32> to vector<16x128xf32>
    %68 = vector.extract_strided_slice %66 {offsets = [16, 0], sizes = [1, 128], strides = [1, 1]} : vector<18x128xf32> to vector<1x128xf32>
    %69 = vector.extract_strided_slice %66 {offsets = [17, 0], sizes = [1, 128], strides = [1, 1]} : vector<18x128xf32> to vector<1x128xf32>
    %cst_39 = arith.constant dense<0xFF800000> : vector<128xf32>
    %70 = vector.multi_reduction <maximumf>, %67, %cst_39 [0] : vector<16x128xf32> to vector<128xf32>
    %71 = vector.shape_cast %70 : vector<128xf32> to vector<1x128xf32>
    %72 = vector.broadcast %71 : vector<1x128xf32> to vector<16x128xf32>
    %73 = arith.subf %67, %72 : vector<16x128xf32>
    %74 = math.exp %73 : vector<16x128xf32>
    %cst_40 = arith.constant dense<0.000000e+00> : vector<128xf32>
    %75 = vector.multi_reduction <add>, %74, %cst_40 [0] : vector<16x128xf32> to vector<128xf32>
    %76 = vector.shape_cast %75 : vector<128xf32> to vector<1x128xf32>
    %77 = tpu.reciprocal %76 {approx = true} : vector<1x128xf32> -> vector<1x128xf32>
    %78 = vector.broadcast %77 : vector<1x128xf32> to vector<16x128xf32>
    %79 = arith.mulf %74, %78 : vector<16x128xf32>
    %c0_41 = arith.constant 0 : index
    %c0_42 = arith.constant 0 : index
    %80 = vector.load %arg3[%c0_41, %c0_42] : memref<32x128xf32, #tpu.memory_space<vmem>>, vector<4x128xf32>
    tpu.vector_store %arg3[%c0_41, %c0_42], %50 {strides = array<i32>} : memref<32x128xf32, #tpu.memory_space<vmem>>, vector<4x128xf32>,
    %c4 = arith.constant 4 : index
    %c0_43 = arith.constant 0 : index
    %81 = vector.load %arg3[%c4, %c0_43] : memref<32x128xf32, #tpu.memory_space<vmem>>, vector<4x128xf32>
    tpu.vector_store %arg3[%c4, %c0_43], %42 {strides = array<i32>} : memref<32x128xf32, #tpu.memory_space<vmem>>, vector<4x128xf32>,
    %c8_44 = arith.constant 8 : index
    %c0_45 = arith.constant 0 : index
    %82 = vector.load %arg3[%c8_44, %c0_45] : memref<32x128xf32, #tpu.memory_space<vmem>>, vector<4x128xf32>
    tpu.vector_store %arg3[%c8_44, %c0_45], %43 {strides = array<i32>} : memref<32x128xf32, #tpu.memory_space<vmem>>, vector<4x128xf32>,
    %c12 = arith.constant 12 : index
    %c0_46 = arith.constant 0 : index
    %83 = vector.load %arg3[%c12, %c0_46] : memref<32x128xf32, #tpu.memory_space<vmem>>, vector<16x128xf32>
    tpu.vector_store %arg3[%c12, %c0_46], %79 {strides = array<i32>} : memref<32x128xf32, #tpu.memory_space<vmem>>, vector<16x128xf32>,
    %c28 = arith.constant 28 : index
    %c0_47 = arith.constant 0 : index
    %84 = vector.load %arg3[%c28, %c0_47] : memref<32x128xf32, #tpu.memory_space<vmem>>, vector<1x128xf32>
    tpu.vector_store %arg3[%c28, %c0_47], %68 {strides = array<i32>} : memref<32x128xf32, #tpu.memory_space<vmem>>, vector<1x128xf32>,
    %c29 = arith.constant 29 : index
    %c0_48 = arith.constant 0 : index
    %85 = vector.load %arg3[%c29, %c0_48] : memref<32x128xf32, #tpu.memory_space<vmem>>, vector<1x128xf32>
    tpu.vector_store %arg3[%c29, %c0_48], %69 {strides = array<i32>} : memref<32x128xf32, #tpu.memory_space<vmem>>, vector<1x128xf32>,
    %cst_49 = arith.constant 0.000000e+00 : f32
    %86 = vector.broadcast %cst_49 : f32 to vector<2x128xf32>
    %c30 = arith.constant 30 : index
    %c0_50 = arith.constant 0 : index
    %87 = vector.load %arg3[%c30, %c0_50] : memref<32x128xf32, #tpu.memory_space<vmem>>, vector<2x128xf32>
    tpu.vector_store %arg3[%c30, %c0_50], %86 {strides = array<i32>} : memref<32x128xf32, #tpu.memory_space<vmem>>, vector<2x128xf32>,
    return
  }
  func.func @transform_0(%arg0: i32) -> (i32, i32) {
    %c0_i32 = arith.constant 0 : i32
    %c0_i32_0 = arith.constant 0 : i32
    return %c0_i32, %arg0 : i32, i32
  }
  func.func @transform_1(%arg0: i32) -> (i32, i32) {
    %c0_i32 = arith.constant 0 : i32
    %c0_i32_0 = arith.constant 0 : i32
    %c0_i32_1 = arith.constant 0 : i32
    return %c0_i32, %c0_i32_0 : i32, i32
  }
  func.func @transform_2(%arg0: i32) -> (i32, i32) {
    %c0_i32 = arith.constant 0 : i32
    %c0_i32_0 = arith.constant 0 : i32
    return %c0_i32, %arg0 : i32, i32
  }
}

</mosaic_0001>

<bundles_post_ra>
// kernel: tpu_custom_call.1
= control target key start
LH: loop header
LB: loop body
LE: loop exit
PB: predicated region body
PF: predicated region fallthrough
CT: control target
= control target key end

     0   :  { %7 = vsyncpa [#allocation3], 0  ;;  %s1086_s0 = inlined_call_operand.hbm [shape: f32[24,128], index: 0, kind: input, shape index: {}]   ;;  %s1087_s1 = inlined_call_operand.hbm [shape: f32[176,128], index: 1, kind: input, shape index: {}]   ;;  %s1088_s2 = inlined_call_operand.hbm [shape: f32[32,128], index: 2, kind: output, shape index: {}]  }
   0x1   :  { %8 = vsyncpa [#allocation6], 0 }
   0x2   :  { %9 = vsyncpa [#allocation4], 0  ;;  %s981_s9 = smov [#allocation2]   ;;  %s909_s13 = scalar_lea.hbm %s1086_s0, 384 }
   0x3   :  { %s15_s10 = sshll.u32 %s981_s9, 4  ;;  %p910_p0 = scmp.ne.s32.totalorder %s1086_s0, %s909_s13  ;;  %s16_s10 = int_to_ptr.vmem [resolvable:$true] %s15_s10 }
   0x4   :  { %p913_p1 = scmp.lt.u32.totalorder %s909_s13, %s1086_s0 }
   0x6   :  { %p915_p2 = pnand %p913_p1, %p910_p0 }
   0x8   :  { %918 = shalt.err (!%p915_p2)
}
   0x9   :  { %s919_s18 = scalar_lea.vmem %s16_s10, 384  ;;  %p924_p4 = scmp.lt.s32.totalorder %s16_s10, %s16_s10 }
   0xa   :  { %p920_p3 = scmp.ne.s32.totalorder %s16_s10, %s919_s18  ;;  %p925_p5 = scmp.lt.s32.totalorder %s919_s18, %s919_s18 }
   0xc   :  { %p926_p6 = por %p925_p5, %p924_p4 }
   0xe   :  { %p927_p7 = pnand %p926_p6, %p920_p3 }
  0x10   :  { %930 = shalt.err (!%p927_p7)
}
  0x11   :  { %s982_s19 = smov 128   ;;  %s983_s20 = smov 8  }
  0x12   :  { %21 = dma.hbm_to_vmem [thread:$0]  %s1086_s0, 384, %s16_s10, [#allocation3], %s982_s19, %s982_s19, %s983_s20  }
  0x13   :  { %s984_s23 = smov [#allocation5]   ;;  %s931_s27 = scalar_lea.hbm %s1087_s1, 2816 }
  0x14   :  { %s27_s24 = sshll.u32 %s984_s23, 4  ;;  %p932_p8 = scmp.ne.s32.totalorder %s1087_s1, %s931_s27  ;;  %s28_s24 = int_to_ptr.vmem [resolvable:$true] %s27_s24 }
  0x15   :  { %p935_p9 = scmp.lt.u32.totalorder %s931_s27, %s1087_s1 }
  0x17   :  { %p937_p10 = pnand %p935_p9, %p932_p8 }
  0x19   :  { %940 = shalt.err (!%p937_p10)
}
  0x1a   :  { %s941_s4 = scalar_lea.vmem %s28_s24, 2816  ;;  %p946_p12 = scmp.lt.s32.totalorder %s28_s24, %s28_s24 }
  0x1b   :  { %p942_p11 = scmp.ne.s32.totalorder %s28_s24, %s941_s4  ;;  %p947_p13 = scmp.lt.s32.totalorder %s941_s4, %s941_s4 }
  0x1d   :  { %p948_p0 = por %p947_p13, %p946_p12 }
  0x1f   :  { %p949_p1 = pnand %p948_p0, %p942_p11 }
  0x21   :  { %952 = shalt.err (!%p949_p1)
}
  0x22   :  { %33 = dma.hbm_to_vmem [thread:$0]  %s1087_s1, 2816, %s28_s24, [#allocation6], %s982_s19, %s982_s19, %s983_s20  }
  0x23   :  { %975 = dma.done.wait [#allocation3], 384  }
  0x24   :  { %976 = vsyncadd [#allocation3], 4294966912 }
  0x25   :  { %977 = dma.done.wait [#allocation6], 2816  }
  0x26   :  { %978 = vsyncadd [#allocation6], 4294964480  ;;  %v985_v0 = vmov 0.0|0.0   ;;  %vm986_vm0 = vmmov 0   ;;  %v987_v1 = vmov 0.0   ;;  %v40_v2 = vld [vmem:[#allocation2] sm:$0xff] }
  0x27   :  { %880 = vmatprep.subr.bf16.mxu1 %v985_v0  ;;  %834 = vmatprep.mubr.msk.f32.mxu1 %vm986_vm0, %v987_v1  ;;  %773 = vst [vmem:[#allocation7 + $0x1e] sm:$0x3] %v987_v1  ;;  %v41_v3 = vld [vmem:[#allocation2 + $0x8] sm:$0xff]  ;;  %v45_v5 = vld [vmem:[#allocation5] sm:$0xff]  ;;  %vm47_vm1 = vcmask 130048   ;;  %v122_v6 = vld [vmem:[#allocation5 + $0x8] sm:$0xff] }
  0x28   :  { %849 = vmatprep.subr.mxu0 %v987_v1  ;;  %851 = vmatprep.mubr.msk.f32.mxu0 %vm986_vm0, %v987_v1  ;;  %v881_v4 = vpack.c.bf16 %v41_v3, %v40_v2  ;;  %vm140_vm2 = vcmask 64512   ;;  %v988_v7 = vmov 8   ;;  %v989_v8 = vmov 9   ;;  %v123_v9 = vld [vmem:[#allocation5 + $0x10] sm:$0x3]  ;;  %v46_v10 = vld [vmem:[#allocation5 + $0x58] sm:$0xff] }
  0x29   :  { %898 = vset.pattern.permute.xlu0 %v988_v7  ;;  %899 = vset.pattern.permute.xlu1 %v989_v8  ;;  %v793_v17 = vld [vmem:[#allocation2 + $0x10] ss:$0 sm:$0xff]  ;;  %v796_v19 = vld [vmem:[#allocation2 + $0x11] ss:$0 sm:$0xff]  ;;  %v237_v28 = vld [vmem:[#allocation5 + $0x68] sm:$0x3] }
  0x2a   :  { %882 = vmatpush3.bf16.msra.mxu1 %v881_v4  ;;  %126 = vperm.xlu0 %898, %v122_v6   ;;  %v236_v31 = vld [vmem:[#allocation5 + $0x60] sm:$0xff]  ;;  %vm248_vm3 = vcmask 1041408   ;;  %vm990_vm4 = vmmov 1   ;;  %v242_v38 = vld [vmem:[#allocation5 + $0x18] sm:$0xff]  ;;  %vm244_vm6 = vcmask 80896   ;;  %v243_v39 = vld [vmem:[#allocation5 + $0x70] sm:$0xff] }
  0x2b   :  { %221 = vperm.xlu1 %899, %v122_v6   ;;  %vm885_vm5 = vmpackc.low %vm248_vm3, %vm990_vm4  ;;  %v323_v44 = vld [vmem:[#allocation5 + $0x20] sm:$0x3f]  ;;  %v324_v45 = vld [vmem:[#allocation5 + $0x78] sm:$0x3f]  ;;  %vm405_vm7 = vcmask 1045504   ;;  %vm401_vm8 = vcmask 48128  }
  0x2c   :  { %v399_v50 = vld [vmem:[#allocation5 + $0x28] sm:$0xff]  ;;  %v400_v51 = vld [vmem:[#allocation5 + $0x80] sm:$0xff]  ;;  %v44_v58 = vld [vmem:[#allocation2 + $0x12] sm:$0xf]  ;;  %vm494_vm9 = vcmask 1043456   ;;  %vm490_vm10 = vcmask 31744  }
  0x2d   :  { %835 = vmatmul.mubr.msk.f32.vlgmr.msra.gmra.mrb[0].mxu1 %vm47_vm1, %v45_v5  ;;  %v488_v63 = vld [vmem:[#allocation5 + $0x30] sm:$0x3f]  ;;  %s991_s1 = smov [#allocation7]  }
  0x2e   :  { %839 = vmatprep.mubr.msk.f32.mxu1 %vm140_vm2, %v122_v6  ;;  %131 = vperm.xlu0 %898, %v123_v9   ;;  %v569_v6 = vld [vmem:[#allocation5 + $0x38] sm:$0xff]  ;;  %v570_v7 = vld [vmem:[#allocation5 + $0x90] sm:$0xff]  ;;  %s779_s6 = sshll.u32 %s991_s1, 4  ;;  %s780_s6 = int_to_ptr.vmem [resolvable:$true] %s779_s6 }
  0x2f   :  { %225 = vperm.xlu1 %899, %v123_v9   ;;  %s953_s7 = scalar_lea.vmem %s780_s6, 512  ;;  %p958_p3 = scmp.lt.s32.totalorder %s780_s6, %s780_s6 }
  0x30   :  { %p954_p2 = scmp.ne.s32.totalorder %s780_s6, %s953_s7  ;;  %p959_p4 = scmp.lt.s32.totalorder %s953_s7, %s953_s7 }
  0x32   :  { %900 = vset.pattern.permute.xlu0 %v989_v8  ;;  %p960_p5 = por %p959_p4, %p958_p3 }
  0x34   :  { %p961_p6 = pnand %p960_p5, %p954_p2 }
  0xa9   :  { %v127_v15 = vpop.permute.xlu0 %126 }
  0xaa   :  { %v222_v16 = vpop.permute.xlu1 %221  ;;  %v138_v22 = vmul.f32 %v793_v17, %v127_v15 }
  0xab   :  { %v232_v27 = vmul.f32 %v796_v19, %v222_v16 }
  0xad   :  { %v132_v18 = vpop.permute.xlu0 %131 }
  0xae   :  { %v226_v20 = vpop.permute.xlu1 %225  ;;  %v139_v21 = vmul.f32 %v793_v17, %v132_v18  ;;  %v651_v17 = vld [vmem:[#allocation5 + $0x98] sm:$0xff]  ;;  %v652_v18 = vld [vmem:[#allocation5 + $0xa0] sm:$0xff] }
  0xaf   :  { %v233_v24 = vmul.f32 %v796_v19, %v226_v20 }
 0x100   :  { %v117_v11 = vpop.f32.mrb[0].mxu1 }
 0x101   :  { %v118_v12 = vadd.f32 %v117_v11, %v46_v10  ;;  %v836_v13 = vpop.f32.mrb[1].mxu1 }
 0x102   :  { %v649_v13 = vld [vmem:[#allocation5 + $0x48] sm:$0xff] }
 0x103   :  { %v121_v14 = vmax.f32 %v118_v12, 0.0  ;;  %v648_v12 = vld [vmem:[#allocation5 + $0x40] sm:$0xff] }
 0x105   :  { %837 = vmatprep.subr.mxu1 %v121_v14 }
 0x106   :  { %838 = vmatpush3.msra.mxu1 %v121_v14  ;;  %v650_v14 = vld [vmem:[#allocation5 + $0x50] sm:$0x3] }
 0x107   :  { %840 = vmatmul.mubr.msk.f32.vlgmr.msra.gmra.mrb[2].mxu1 %vm140_vm2, %v123_v9  ;;  %883 = vmatprep.subr.bf16.mxu1 %v985_v0  ;;  %v489_v0 = vld [vmem:[#allocation5 + $0x88] sm:$0x3f] }
 0x108   :  { %846 = vmatprep.mubr.msk.f32.mxu1 %vm986_vm0, %v987_v1 }
 0x1da   :  { %v841_v23 = vpop.f32.mrb[2].mxu1 }
 0x1db   :  { %v217_v25 = vadd.f32 %v841_v23, %v139_v21  ;;  %v211_v26 = vpop.f32.mrb[3].mxu1  ;;  %v653_v23 = vld [vmem:[#allocation5 + $0xa8] sm:$0x3] }
 0x1dc   :  { %v212_v29 = vadd.f32 %v211_v26, %v138_v22 }
 0x1dd   :  { %v235_v30 = vadd.f32 %v233_v24, %v217_v25 }
 0x1de   :  { %v234_v32 = vadd.f32 %v232_v27, %v212_v29 }
 0x1df   :  { %v239_v33 = vadd.f32 %v237_v28, %v235_v30 }
 0x1e0   :  { %v238_v34 = vadd.f32 %v236_v31, %v234_v32 }
 0x1e1   :  { %v241_v35 = vmax.f32 %v239_v33, 0.0 }
 0x1e2   :  { %v240_v36 = vmax.f32 %v238_v34, 0.0 }
 0x1e4   :  { %v884_v37 = vpack.c.bf16 %v241_v35, %v240_v36 }
 0x1e6   :  { %886 = vmatpush3.bf16.msk.msra.mxu1 %vm885_vm5, %v884_v37 }
 0x1e7   :  { %854 = vmatprep.subr.mxu1 %v987_v1 }
 0x1e9   :  { %847 = vmatmul.mubr.msk.f32.vlgmr.msra.gmra.mrb[4].mxu1 %vm244_vm6, %v242_v38 }
 0x1ea   :  { %856 = vmatprep.mubr.msk.f32.mxu1 %vm986_vm0, %v987_v1 }
 0x2bc   :  { %v318_v40 = vpop.f32.mrb[4].mxu1 }
 0x2bd   :  { %v319_v41 = vadd.f32 %v318_v40, %v243_v39  ;;  %v848_v42 = vpop.f32.mrb[5].mxu1 }
 0x2bf   :  { %v322_v43 = vmax.f32 %v319_v41, 0.0 }
 0x2c1   :  { %850 = vmatpush3.msra.mxu0 %v322_v43 }
 0x2c2   :  { %852 = vmatmul.mubr.msk.f32.vlgmr.msra.gmra.mrb[0].mxu0 %vm140_vm2, %v323_v44  ;;  %859 = vmatprep.subr.mxu0 %v987_v1 }
 0x2c3   :  { %861 = vmatprep.mubr.msk.f32.mxu0 %vm986_vm0, %v987_v1 }
 0x395   :  { %v394_v46 = vpop.f32.mrb[0].mxu0 }
 0x396   :  { %v395_v47 = vadd.f32 %v394_v46, %v324_v45  ;;  %v853_v48 = vpop.f32.mrb[1].mxu0 }
 0x398   :  { %v398_v49 = vmax.f32 %v395_v47, 0.0 }
 0x39a   :  { %855 = vmatpush3.msk.msra.mxu1 %vm405_vm7, %v398_v49 }
 0x39b   :  { %857 = vmatmul.mubr.msk.f32.vlgmr.msra.gmra.mrb[6].mxu1 %vm401_vm8, %v399_v50  ;;  %864 = vmatprep.subr.mxu1 %v987_v1 }
 0x39c   :  { %866 = vmatprep.mubr.msk.f32.mxu1 %vm986_vm0, %v987_v1 }
 0x46e   :  { %v475_v52 = vpop.f32.mrb[6].mxu1 }
 0x46f   :  { %v476_v53 = vadd.f32 %v475_v52, %v400_v51  ;;  %v858_v54 = vpop.f32.mrb[7].mxu1 }
 0x471   :  { %v480_v55 = vmul.f32 0.5, %v476_v53  ;;  %767 = vst [vmem:[#allocation7 + $0x4] sm:$0xff] %v476_v53   ;;  %v479_v60 = vadd.f32 1e-06, %v476_v53 }
 0x473   :  { %v481_v56 = vmul.f32 1.442695, %v480_v55 }
 0x475   :  { %901 = vpow2.f32 %v481_v56 }
 0x47f   :  { %v902_v57 = vpop.eup %901 }
 0x480   :  { %v484_v59 = vrot.slane %v902_v57, 4 }
 0x482   :  { %v486_v61 = vmul.f32 %v484_v59, %v44_v58 }
 0x484   :  { %v487_v62 = vadd.f32 %v486_v61, %v479_v60 }
 0x486   :  { %766 = vst [vmem:[#allocation7] sm:$0xf] %v487_v62  ;;  %860 = vmatpush3.msk.msra.mxu0 %vm494_vm9, %v487_v62 }
 0x487   :  { %862 = vmatmul.mubr.msk.f32.vlgmr.msra.gmra.mrb[2].mxu0 %vm490_vm10, %v488_v63  ;;  %869 = vmatprep.subr.mxu0 %v987_v1 }
 0x488   :  { %871 = vmatprep.mubr.msk.f32.mxu0 %vm986_vm0, %v987_v1 }
 0x55a   :  { %v564_v2 = vpop.f32.mrb[2].mxu0 }
 0x55b   :  { %v565_v3 = vadd.f32 %v564_v2, %v489_v0  ;;  %v863_v4 = vpop.f32.mrb[3].mxu0 }
 0x55d   :  { %v568_v5 = vmax.f32 %v565_v3, 0.0 }
 0x55f   :  { %865 = vmatpush3.msk.msra.mxu1 %vm405_vm7, %v568_v5 }
 0x560   :  { %867 = vmatmul.mubr.msk.f32.vlgmr.msra.gmra.mrb[8].mxu1 %vm401_vm8, %v569_v6 }
 0x633   :  { %v643_v8 = vpop.f32.mrb[8].mxu1 }
 0x634   :  { %v644_v9 = vadd.f32 %v643_v8, %v570_v7  ;;  %v868_v10 = vpop.f32.mrb[9].mxu1 }
 0x636   :  { %v647_v11 = vmax.f32 %v644_v9, 0.0 }
 0x638   :  { %870 = vmatpush3.msra.mxu0 %v647_v11 }
 0x639   :  { %872 = vmatmul.mubr.msk.f32.vlgmr.msra.gmra.mrb[4].mxu0 %vm140_vm2, %v648_v12 }
 0x63a   :  { %874 = vmatprep.mubr.msk.f32.mxu0 %vm986_vm0, %v987_v1 }
 0x63d   :  { %875 = vmatmul.mubr.msk.f32.gmra.mrb[6].mxu0 %vm140_vm2, %v649_v13 }
 0x63e   :  { %877 = vmatprep.mubr.msk.f32.mxu0 %vm986_vm0, %v987_v1 }
 0x641   :  { %878 = vmatmul.mubr.msk.f32.gmra.mrb[8].mxu0 %vm140_vm2, %v650_v14 }
 0x70c   :  { %v729_v15 = vpop.f32.mrb[4].mxu0 }
 0x70d   :  { %v873_v16 = vpop.f32.mrb[5].mxu0  ;;  %v730_v20 = vadd.f32 %v729_v15, %v651_v17 }
 0x710   :  { %v734_v19 = vpop.f32.mrb[6].mxu0 }
 0x711   :  { %v735_v21 = vadd.f32 %v734_v19, %v652_v18  ;;  %v876_v22 = vpop.f32.mrb[7].mxu0 }
 0x713   :  { %v743_v24 = vmax.f32 %v730_v20, %v735_v21 }
 0x714   :  { %v739_v25 = vpop.f32.mrb[8].mxu0 }
 0x715   :  { %v744_v26 = vrot.slane %v743_v24, 4  ;;  %v740_v27 = vadd.f32 %v739_v25, %v653_v23  ;;  %v879_v28 = vpop.f32.mrb[9].mxu0 }
 0x717   :  { %v745_v29 = vmax.f32 %v743_v24, %v744_v26  ;;  %771 = vst [vmem:[#allocation7 + $0x1c] sm:$0x3] %v740_v27  }
 0x719   :  { %v746_v1 = vrot.slane %v745_v29, 2 }
 0x71b   :  { %v747_v30 = vmax.f32 %v745_v29, %v746_v1 }
 0x71d   :  { %v748_v31 = vrot.slane %v747_v30, 1 }
 0x71f   :  { %v749_v32 = vmax.f32 %v747_v30, %v748_v31 }
 0x721   :  { %v750_v33 = vsub.f32 %v730_v20, %v749_v32  ;;  %v751_v34 = vsub.f32 %v735_v21, %v749_v32 }
 0x723   :  { %v752_v35 = vmul.f32 1.442695, %v750_v33  ;;  %v754_v36 = vmul.f32 1.442695, %v751_v34 }
 0x725   :  { %903 = vpow2.f32 %v752_v35 }
 0x726   :  { %905 = vpow2.f32 %v754_v36 }
 0x72f   :  { %v904_v37 = vpop.eup %903 }
 0x730   :  { %v906_v38 = vpop.eup %905 }
 0x731   :  { %v756_v39 = vadd.f32 %v906_v38, %v904_v37 }
 0x733   :  { %v757_v40 = vrot.slane %v756_v39, 4 }
 0x735   :  { %v758_v41 = vadd.f32 %v757_v40, %v756_v39 }
 0x737   :  { %v759_v42 = vrot.slane %v758_v41, 2 }
 0x739   :  { %v760_v43 = vadd.f32 %v759_v42, %v758_v41 }
 0x73b   :  { %v761_v44 = vrot.slane %v760_v43, 1 }
 0x73d   :  { %v762_v45 = vadd.f32 %v761_v44, %v760_v43 }
 0x73f   :  { %907 = vrcp.f32 %v762_v45 }
 0x749   :  { %v908_v46 = vpop.eup %907 }
 0x74a   :  { %v764_v47 = vmul.f32 %v908_v46, %v904_v37  ;;  %v765_v48 = vmul.f32 %v908_v46, %v906_v38 }
 0x74c   :  { %769 = vst [vmem:[#allocation7 + $0xc] sm:$0xff] %v764_v47  ;;  %770 = vst [vmem:[#allocation7 + $0x14] sm:$0xff] %v765_v48 }
 0x74d   :  { %964 = shalt.err (!%p961_p6)
}
 0x74e   :  { %s965_s10 = scalar_lea.hbm %s1088_s2, 512 }
 0x74f   :  { %p966_p7 = scmp.ne.s32.totalorder %s1088_s2, %s965_s10  ;;  %p969_p8 = scmp.lt.u32.totalorder %s965_s10, %s1088_s2 }
 0x751   :  { %p971_p9 = pnand %p969_p8, %p966_p7 }
 0x753   :  { %974 = shalt.err (!%p971_p9)
}
 0x754   :  { %785 = dma.vmem_to_hbm [thread:$0]  %s780_s6, 512, %s1088_s2, [#allocation4], %s982_s19, %s982_s19, %s983_s20  }
 0x755   :  { %979 = dma.done.wait [#allocation4], 512  }
 0x756   :  { %980 = vsyncadd [#allocation4], 4294966784 }
 0x757   :  { %789 = vsyncpa [#allocation3], 1 }
 0x758   :  { %790 = vsyncpa [#allocation6], 1 }
 0x759   :  { %791 = vsyncpa [#allocation4], 1 }

// kernel: tpu_custom_call.1
= control target key start
LH: loop header
LB: loop body
LE: loop exit
PB: predicated region body
PF: predicated region fallthrough
CT: control target
= control target key end

     0   :  { %7 = vsyncpa [#allocation3], 0  ;;  %s1086_s0 = inlined_call_operand.hbm [shape: f32[24,128], index: 0, kind: input, shape index: {}]   ;;  %s1087_s1 = inlined_call_operand.hbm [shape: f32[176,128], index: 1, kind: input, shape index: {}]   ;;  %s1088_s2 = inlined_call_operand.hbm [shape: f32[32,128], index: 2, kind: output, shape index: {}]  }
   0x1   :  { %8 = vsyncpa [#allocation6], 0 }
   0x2   :  { %9 = vsyncpa [#allocation4], 0  ;;  %s981_s9 = smov [#allocation2]   ;;  %s909_s13 = scalar_lea.hbm %s1086_s0, 384 }
   0x3   :  { %s15_s10 = sshll.u32 %s981_s9, 4  ;;  %p910_p0 = scmp.ne.s32.totalorder %s1086_s0, %s909_s13  ;;  %s16_s10 = int_to_ptr.vmem [resolvable:$true] %s15_s10 }
   0x4   :  { %p913_p1 = scmp.lt.u32.totalorder %s909_s13, %s1086_s0 }
   0x6   :  { %p915_p2 = pnand %p913_p1, %p910_p0 }
   0x8   :  { %918 = shalt.err (!%p915_p2)
}
   0x9   :  { %s919_s18 = scalar_lea.vmem %s16_s10, 384  ;;  %p924_p4 = scmp.lt.s32.totalorder %s16_s10, %s16_s10 }
   0xa   :  { %p920_p3 = scmp.ne.s32.totalorder %s16_s10, %s919_s18  ;;  %p925_p5 = scmp.lt.s32.totalorder %s919_s18, %s919_s18 }
   0xc   :  { %p926_p6 = por %p925_p5, %p924_p4 }
   0xe   :  { %p927_p7 = pnand %p926_p6, %p920_p3 }
  0x10   :  { %930 = shalt.err (!%p927_p7)
}
  0x11   :  { %s982_s19 = smov 128   ;;  %s983_s20 = smov 8  }
  0x12   :  { %21 = dma.hbm_to_vmem [thread:$0]  %s1086_s0, 384, %s16_s10, [#allocation3], %s982_s19, %s982_s19, %s983_s20  }
  0x13   :  { %s984_s23 = smov [#allocation5]   ;;  %s931_s27 = scalar_lea.hbm %s1087_s1, 2816 }
  0x14   :  { %s27_s24 = sshll.u32 %s984_s23, 4  ;;  %p932_p8 = scmp.ne.s32.totalorder %s1087_s1, %s931_s27  ;;  %s28_s24 = int_to_ptr.vmem [resolvable:$true] %s27_s24 }
  0x15   :  { %p935_p9 = scmp.lt.u32.totalorder %s931_s27, %s1087_s1 }
  0x17   :  { %p937_p10 = pnand %p935_p9, %p932_p8 }
  0x19   :  { %940 = shalt.err (!%p937_p10)
}
  0x1a   :  { %s941_s4 = scalar_lea.vmem %s28_s24, 2816  ;;  %p946_p12 = scmp.lt.s32.totalorder %s28_s24, %s28_s24 }
  0x1b   :  { %p942_p11 = scmp.ne.s32.totalorder %s28_s24, %s941_s4  ;;  %p947_p13 = scmp.lt.s32.totalorder %s941_s4, %s941_s4 }
  0x1d   :  { %p948_p0 = por %p947_p13, %p946_p12 }
  0x1f   :  { %p949_p1 = pnand %p948_p0, %p942_p11 }
  0x21   :  { %952 = shalt.err (!%p949_p1)
}
  0x22   :  { %33 = dma.hbm_to_vmem [thread:$0]  %s1087_s1, 2816, %s28_s24, [#allocation6], %s982_s19, %s982_s19, %s983_s20  }
  0x23   :  { %975 = dma.done.wait [#allocation3], 384  }
  0x24   :  { %976 = vsyncadd [#allocation3], 4294966912 }
  0x25   :  { %977 = dma.done.wait [#allocation6], 2816  }
  0x26   :  { %978 = vsyncadd [#allocation6], 4294964480  ;;  %v985_v0 = vmov 0.0|0.0   ;;  %vm986_vm0 = vmmov 0   ;;  %v987_v1 = vmov 0.0   ;;  %v40_v2 = vld [vmem:[#allocation2] sm:$0xff] }
  0x27   :  { %880 = vmatprep.subr.bf16.mxu1 %v985_v0  ;;  %834 = vmatprep.mubr.msk.f32.mxu1 %vm986_vm0, %v987_v1  ;;  %773 = vst [vmem:[#allocation7 + $0x1e] sm:$0x3] %v987_v1  ;;  %v41_v3 = vld [vmem:[#allocation2 + $0x8] sm:$0xff]  ;;  %v45_v5 = vld [vmem:[#allocation5] sm:$0xff]  ;;  %vm47_vm1 = vcmask 130048   ;;  %v122_v6 = vld [vmem:[#allocation5 + $0x8] sm:$0xff] }
  0x28   :  { %849 = vmatprep.subr.mxu0 %v987_v1  ;;  %851 = vmatprep.mubr.msk.f32.mxu0 %vm986_vm0, %v987_v1  ;;  %v881_v4 = vpack.c.bf16 %v41_v3, %v40_v2  ;;  %vm140_vm2 = vcmask 64512   ;;  %v988_v7 = vmov 8   ;;  %v989_v8 = vmov 9   ;;  %v123_v9 = vld [vmem:[#allocation5 + $0x10] sm:$0x3]  ;;  %v46_v10 = vld [vmem:[#allocation5 + $0x58] sm:$0xff] }
  0x29   :  { %898 = vset.pattern.permute.xlu0 %v988_v7  ;;  %899 = vset.pattern.permute.xlu1 %v989_v8  ;;  %v793_v17 = vld [vmem:[#allocation2 + $0x10] ss:$0 sm:$0xff]  ;;  %v796_v19 = vld [vmem:[#allocation2 + $0x11] ss:$0 sm:$0xff]  ;;  %v237_v28 = vld [vmem:[#allocation5 + $0x68] sm:$0x3] }
  0x2a   :  { %882 = vmatpush3.bf16.msra.mxu1 %v881_v4  ;;  %126 = vperm.xlu0 %898, %v122_v6   ;;  %v236_v31 = vld [vmem:[#allocation5 + $0x60] sm:$0xff]  ;;  %vm248_vm3 = vcmask 1041408   ;;  %vm990_vm4 = vmmov 1   ;;  %v242_v38 = vld [vmem:[#allocation5 + $0x18] sm:$0xff]  ;;  %vm244_vm6 = vcmask 80896   ;;  %v243_v39 = vld [vmem:[#allocation5 + $0x70] sm:$0xff] }
  0x2b   :  { %221 = vperm.xlu1 %899, %v122_v6   ;;  %vm885_vm5 = vmpackc.low %vm248_vm3, %vm990_vm4  ;;  %v323_v44 = vld [vmem:[#allocation5 + $0x20] sm:$0x3f]  ;;  %v324_v45 = vld [vmem:[#allocation5 + $0x78] sm:$0x3f]  ;;  %vm405_vm7 = vcmask 1045504   ;;  %vm401_vm8 = vcmask 48128  }
  0x2c   :  { %v399_v50 = vld [vmem:[#allocation5 + $0x28] sm:$0xff]  ;;  %v400_v51 = vld [vmem:[#allocation5 + $0x80] sm:$0xff]  ;;  %v44_v58 = vld [vmem:[#allocation2 + $0x12] sm:$0xf]  ;;  %vm494_vm9 = vcmask 1043456   ;;  %vm490_vm10 = vcmask 31744  }
  0x2d   :  { %835 = vmatmul.mubr.msk.f32.vlgmr.msra.gmra.mrb[0].mxu1 %vm47_vm1, %v45_v5  ;;  %v488_v63 = vld [vmem:[#allocation5 + $0x30] sm:$0x3f]  ;;  %s991_s1 = smov [#allocation7]  }
  0x2e   :  { %839 = vmatprep.mubr.msk.f32.mxu1 %vm140_vm2, %v122_v6  ;;  %131 = vperm.xlu0 %898, %v123_v9   ;;  %v569_v6 = vld [vmem:[#allocation5 + $0x38] sm:$0xff]  ;;  %v570_v7 = vld [vmem:[#allocation5 + $0x90] sm:$0xff]  ;;  %s779_s6 = sshll.u32 %s991_s1, 4  ;;  %s780_s6 = int_to_ptr.vmem [resolvable:$true] %s779_s6 }
  0x2f   :  { %225 = vperm.xlu1 %899, %v123_v9   ;;  %s953_s7 = scalar_lea.vmem %s780_s6, 512  ;;  %p958_p3 = scmp.lt.s32.totalorder %s780_s6, %s780_s6 }
  0x30   :  { %p954_p2 = scmp.ne.s32.totalorder %s780_s6, %s953_s7  ;;  %p959_p4 = scmp.lt.s32.totalorder %s953_s7, %s953_s7 }
  0x32   :  { %900 = vset.pattern.permute.xlu0 %v989_v8  ;;  %p960_p5 = por %p959_p4, %p958_p3 }
  0x34   :  { %p961_p6 = pnand %p960_p5, %p954_p2 }
  0xa9   :  { %v127_v15 = vpop.permute.xlu0 %126 }
  0xaa   :  { %v222_v16 = vpop.permute.xlu1 %221  ;;  %v138_v22 = vmul.f32 %v793_v17, %v127_v15 }
  0xab   :  { %v232_v27 = vmul.f32 %v796_v19, %v222_v16 }
  0xad   :  { %v132_v18 = vpop.permute.xlu0 %131 }
  0xae   :  { %v226_v20 = vpop.permute.xlu1 %225  ;;  %v139_v21 = vmul.f32 %v793_v17, %v132_v18  ;;  %v651_v17 = vld [vmem:[#allocation5 + $0x98] sm:$0xff]  ;;  %v652_v18 = vld [vmem:[#allocation5 + $0xa0] sm:$0xff] }
  0xaf   :  { %v233_v24 = vmul.f32 %v796_v19, %v226_v20 }
 0x100   :  { %v117_v11 = vpop.f32.mrb[0].mxu1 }
 0x101   :  { %v118_v12 = vadd.f32 %v117_v11, %v46_v10  ;;  %v836_v13 = vpop.f32.mrb[1].mxu1 }
 0x102   :  { %v649_v13 = vld [vmem:[#allocation5 + $0x48] sm:$0xff] }
 0x103   :  { %v121_v14 = vmax.f32 %v118_v12, 0.0  ;;  %v648_v12 = vld [vmem:[#allocation5 + $0x40] sm:$0xff] }
 0x105   :  { %837 = vmatprep.subr.mxu1 %v121_v14 }
 0x106   :  { %838 = vmatpush3.msra.mxu1 %v121_v14  ;;  %v650_v14 = vld [vmem:[#allocation5 + $0x50] sm:$0x3] }
 0x107   :  { %840 = vmatmul.mubr.msk.f32.vlgmr.msra.gmra.mrb[2].mxu1 %vm140_vm2, %v123_v9  ;;  %883 = vmatprep.subr.bf16.mxu1 %v985_v0  ;;  %v489_v0 = vld [vmem:[#allocation5 + $0x88] sm:$0x3f] }
 0x108   :  { %846 = vmatprep.mubr.msk.f32.mxu1 %vm986_vm0, %v987_v1 }
 0x1da   :  { %v841_v23 = vpop.f32.mrb[2].mxu1 }
 0x1db   :  { %v217_v25 = vadd.f32 %v841_v23, %v139_v21  ;;  %v211_v26 = vpop.f32.mrb[3].mxu1  ;;  %v653_v23 = vld [vmem:[#allocation5 + $0xa8] sm:$0x3] }
 0x1dc   :  { %v212_v29 = vadd.f32 %v211_v26, %v138_v22 }
 0x1dd   :  { %v235_v30 = vadd.f32 %v233_v24, %v217_v25 }
 0x1de   :  { %v234_v32 = vadd.f32 %v232_v27, %v212_v29 }
 0x1df   :  { %v239_v33 = vadd.f32 %v237_v28, %v235_v30 }
 0x1e0   :  { %v238_v34 = vadd.f32 %v236_v31, %v234_v32 }
 0x1e1   :  { %v241_v35 = vmax.f32 %v239_v33, 0.0 }
 0x1e2   :  { %v240_v36 = vmax.f32 %v238_v34, 0.0 }
 0x1e4   :  { %v884_v37 = vpack.c.bf16 %v241_v35, %v240_v36 }
 0x1e6   :  { %886 = vmatpush3.bf16.msk.msra.mxu1 %vm885_vm5, %v884_v37 }
 0x1e7   :  { %854 = vmatprep.subr.mxu1 %v987_v1 }
 0x1e9   :  { %847 = vmatmul.mubr.msk.f32.vlgmr.msra.gmra.mrb[4].mxu1 %vm244_vm6, %v242_v38 }
 0x1ea   :  { %856 = vmatprep.mubr.msk.f32.mxu1 %vm986_vm0, %v987_v1 }
 0x2bc   :  { %v318_v40 = vpop.f32.mrb[4].mxu1 }
 0x2bd   :  { %v319_v41 = vadd.f32 %v318_v40, %v243_v39  ;;  %v848_v42 = vpop.f32.mrb[5].mxu1 }
 0x2bf   :  { %v322_v43 = vmax.f32 %v319_v41, 0.0 }
 0x2c1   :  { %850 = vmatpush3.msra.mxu0 %v322_v43 }
 0x2c2   :  { %852 = vmatmul.mubr.msk.f32.vlgmr.msra.gmra.mrb[0].mxu0 %vm140_vm2, %v323_v44  ;;  %859 = vmatprep.subr.mxu0 %v987_v1 }
 0x2c3   :  { %861 = vmatprep.mubr.msk.f32.mxu0 %vm986_vm0, %v987_v1 }
 0x395   :  { %v394_v46 = vpop.f32.mrb[0].mxu0 }
 0x396   :  { %v395_v47 = vadd.f32 %v394_v46, %v324_v45  ;;  %v853_v48 = vpop.f32.mrb[1].mxu0 }
 0x398   :  { %v398_v49 = vmax.f32 %v395_v47, 0.0 }
 0x39a   :  { %855 = vmatpush3.msk.msra.mxu1 %vm405_vm7, %v398_v49 }
 0x39b   :  { %857 = vmatmul.mubr.msk.f32.vlgmr.msra.gmra.mrb[6].mxu1 %vm401_vm8, %v399_v50  ;;  %864 = vmatprep.subr.mxu1 %v987_v1 }
 0x39c   :  { %866 = vmatprep.mubr.msk.f32.mxu1 %vm986_vm0, %v987_v1 }
 0x46e   :  { %v475_v52 = vpop.f32.mrb[6].mxu1 }
 0x46f   :  { %v476_v53 = vadd.f32 %v475_v52, %v400_v51  ;;  %v858_v54 = vpop.f32.mrb[7].mxu1 }
 0x471   :  { %v480_v55 = vmul.f32 0.5, %v476_v53  ;;  %767 = vst [vmem:[#allocation7 + $0x4] sm:$0xff] %v476_v53   ;;  %v479_v60 = vadd.f32 1e-06, %v476_v53 }
 0x473   :  { %v481_v56 = vmul.f32 1.442695, %v480_v55 }
 0x475   :  { %901 = vpow2.f32 %v481_v56 }
 0x47f   :  { %v902_v57 = vpop.eup %901 }
 0x480   :  { %v484_v59 = vrot.slane %v902_v57, 4 }
 0x482   :  { %v486_v61 = vmul.f32 %v484_v59, %v44_v58 }
 0x484   :  { %v487_v62 = vadd.f32 %v486_v61, %v479_v60 }
 0x486   :  { %766 = vst [vmem:[#allocation7] sm:$0xf] %v487_v62  ;;  %860 = vmatpush3.msk.msra.mxu0 %vm494_vm9, %v487_v62 }
 0x487   :  { %862 = vmatmul.mubr.msk.f32.vlgmr.msra.gmra.mrb[2].mxu0 %vm490_vm10, %v488_v63  ;;  %869 = vmatprep.subr.mxu0 %v987_v1 }
 0x488   :  { %871 = vmatprep.mubr.msk.f32.mxu0 %vm986_vm0, %v987_v1 }
 0x55a   :  { %v564_v2 = vpop.f32.mrb[2].mxu0 }
 0x55b   :  { %v565_v3 = vadd.f32 %v564_v2, %v489_v0  ;;  %v863_v4 = vpop.f32.mrb[3].mxu0 }
 0x55d   :  { %v568_v5 = vmax.f32 %v565_v3, 0.0 }
 0x55f   :  { %865 = vmatpush3.msk.msra.mxu1 %vm405_vm7, %v568_v5 }
 0x560   :  { %867 = vmatmul.mubr.msk.f32.vlgmr.msra.gmra.mrb[8].mxu1 %vm401_vm8, %v569_v6 }
 0x633   :  { %v643_v8 = vpop.f32.mrb[8].mxu1 }
 0x634   :  { %v644_v9 = vadd.f32 %v643_v8, %v570_v7  ;;  %v868_v10 = vpop.f32.mrb[9].mxu1 }
 0x636   :  { %v647_v11 = vmax.f32 %v644_v9, 0.0 }
 0x638   :  { %870 = vmatpush3.msra.mxu0 %v647_v11 }
 0x639   :  { %872 = vmatmul.mubr.msk.f32.vlgmr.msra.gmra.mrb[4].mxu0 %vm140_vm2, %v648_v12 }
 0x63a   :  { %874 = vmatprep.mubr.msk.f32.mxu0 %vm986_vm0, %v987_v1 }
 0x63d   :  { %875 = vmatmul.mubr.msk.f32.gmra.mrb[6].mxu0 %vm140_vm2, %v649_v13 }
 0x63e   :  { %877 = vmatprep.mubr.msk.f32.mxu0 %vm986_vm0, %v987_v1 }
 0x641   :  { %878 = vmatmul.mubr.msk.f32.gmra.mrb[8].mxu0 %vm140_vm2, %v650_v14 }
 0x70c   :  { %v729_v15 = vpop.f32.mrb[4].mxu0 }
 0x70d   :  { %v873_v16 = vpop.f32.mrb[5].mxu0  ;;  %v730_v20 = vadd.f32 %v729_v15, %v651_v17 }
 0x710   :  { %v734_v19 = vpop.f32.mrb[6].mxu0 }
 0x711   :  { %v735_v21 = vadd.f32 %v734_v19, %v652_v18  ;;  %v876_v22 = vpop.f32.mrb[7].mxu0 }
 0x713   :  { %v743_v24 = vmax.f32 %v730_v20, %v735_v21 }
 0x714   :  { %v739_v25 = vpop.f32.mrb[8].mxu0 }
 0x715   :  { %v744_v26 = vrot.slane %v743_v24, 4  ;;  %v740_v27 = vadd.f32 %v739_v25, %v653_v23  ;;  %v879_v28 = vpop.f32.mrb[9].mxu0 }
 0x717   :  { %v745_v29 = vmax.f32 %v743_v24, %v744_v26  ;;  %771 = vst [vmem:[#allocation7 + $0x1c] sm:$0x3] %v740_v27  }
 0x719   :  { %v746_v1 = vrot.slane %v745_v29, 2 }
 0x71b   :  { %v747_v30 = vmax.f32 %v745_v29, %v746_v1 }
 0x71d   :  { %v748_v31 = vrot.slane %v747_v30, 1 }
 0x71f   :  { %v749_v32 = vmax.f32 %v747_v30, %v748_v31 }
 0x721   :  { %v750_v33 = vsub.f32 %v730_v20, %v749_v32  ;;  %v751_v34 = vsub.f32 %v735_v21, %v749_v32 }
 0x723   :  { %v752_v35 = vmul.f32 1.442695, %v750_v33  ;;  %v754_v36 = vmul.f32 1.442695, %v751_v34 }
 0x725   :  { %903 = vpow2.f32 %v752_v35 }
 0x726   :  { %905 = vpow2.f32 %v754_v36 }
 0x72f   :  { %v904_v37 = vpop.eup %903 }
 0x730   :  { %v906_v38 = vpop.eup %905 }
 0x731   :  { %v756_v39 = vadd.f32 %v906_v38, %v904_v37 }
 0x733   :  { %v757_v40 = vrot.slane %v756_v39, 4 }
 0x735   :  { %v758_v41 = vadd.f32 %v757_v40, %v756_v39 }
 0x737   :  { %v759_v42 = vrot.slane %v758_v41, 2 }
 0x739   :  { %v760_v43 = vadd.f32 %v759_v42, %v758_v41 }
 0x73b   :  { %v761_v44 = vrot.slane %v760_v43, 1 }
 0x73d   :  { %v762_v45 = vadd.f32 %v761_v44, %v760_v43 }
 0x73f   :  { %907 = vrcp.f32 %v762_v45 }
 0x749   :  { %v908_v46 = vpop.eup %907 }
 0x74a   :  { %v764_v47 = vmul.f32 %v908_v46, %v904_v37  ;;  %v765_v48 = vmul.f32 %v908_v46, %v906_v38 }
 0x74c   :  { %769 = vst [vmem:[#allocation7 + $0xc] sm:$0xff] %v764_v47  ;;  %770 = vst [vmem:[#allocation7 + $0x14] sm:$0xff] %v765_v48 }
 0x74d   :  { %964 = shalt.err (!%p961_p6)
}
 0x74e   :  { %s965_s10 = scalar_lea.hbm %s1088_s2, 512 }
 0x74f   :  { %p966_p7 = scmp.ne.s32.totalorder %s1088_s2, %s965_s10  ;;  %p969_p8 = scmp.lt.u32.totalorder %s965_s10, %s1088_s2 }
 0x751   :  { %p971_p9 = pnand %p969_p8, %p966_p7 }
 0x753   :  { %974 = shalt.err (!%p971_p9)
}
 0x754   :  { %785 = dma.vmem_to_hbm [thread:$0]  %s780_s6, 512, %s1088_s2, [#allocation4], %s982_s19, %s982_s19, %s983_s20  }
 0x755   :  { %979 = dma.done.wait [#allocation4], 512  }
 0x756   :  { %980 = vsyncadd [#allocation4], 4294966784 }
 0x757   :  { %789 = vsyncpa [#allocation3], 1 }
 0x758   :  { %790 = vsyncpa [#allocation6], 1 }
 0x759   :  { %791 = vsyncpa [#allocation4], 1 }

</bundles_post_ra>
